<compile_context>
chip_gen: v5e
topology: v5e:2x2
jax: 0.10.0
libtpu: 0.0.40
codegen_flags: <defaults>
</compile_context>

<pallas_src>
import functools

import jax
import jax.numpy as jnp
from jax.experimental import pallas as pl
from jax.experimental.pallas import tpu as pltpu


def _round_up(x, m):
    return (x + m - 1) // m * m


def _vmem_capacity_bytes():
    try:
        return int(pltpu.get_tpu_info().vmem_capacity_bytes)
    except Exception:
        return 64 << 20  # conservative default (v7x per-TC VMEM)


def _device_budgets():
    """(per-step working-set budget, scoped vmem_limit_bytes) tuned per TPU generation."""
    cap = _vmem_capacity_bytes()
    if cap >= (96 << 20):            # v5e / v6e: 128 MiB physical VMEM
        return 20 << 20, 64 << 20
    return 10 << 20, 36 << 20        # v7x (64 MiB): keep headroom under the limit


def _pick_block_h(H, Wp, Kp, Cp, *, in_bytes, out_bytes, budget, f32_tmp_copies, max_th):
    """Largest divisor of H (<= max_th) whose per-step working set fits the budget."""
    best = 1
    for th in (d for d in range(1, H + 1) if H % d == 0 and d <= max_th):
        need = (2 * (th + 2) * Wp * Kp * in_bytes        # double-buffered input tile
                + 2 * th * Wp * Cp * out_bytes           # double-buffered output tile
                + f32_tmp_copies * th * Wp * Cp * 4      # f32 intermediates (acc / hash)
                + 2 * 3 * Kp * Cp * in_bytes             # weights (double-buffered)
                + 4 * Cp * 4)                            # scale / bias
        if need <= budget and th > best:
            best = th
    return best


def _conv_bn_relu_drop_kernel(seed_ref, x_ref, w_ref, scale_ref, bias_ref, o_ref,
                              *, apply_dropout, drop_threshold):
    # x_ref:     (1, 1, TH+2, Wp, Kp)  bf16  haloed input row-tile, dx folded into K
    # w_ref:     (3, Kp, Cp)           bf16  weights, K index = dx*Cin + ci
    # scale_ref: (1, Cp)               f32   folded BN scale (x keep-scale if dropout)
    # bias_ref:  (1, Cp)               f32   folded BN bias  (x keep-scale if dropout)
    # o_ref:     (1, 1, TH, Wp, Cp)
    TH = o_ref.shape[2]
    Wp = o_ref.shape[3]
    Cp = o_ref.shape[4]
    Kp = x_ref.shape[4]

    # Flatten (rows, Wp) onto the sublane axis once; the three dy taps become
    # sublane-offset slices at multiples of Wp (Wp is a multiple of the sublane tile).
    x = x_ref[0, 0].reshape((TH + 2) * Wp, Kp)

    # 3x3 conv == 3 MXU matmuls with K = 3*Cin (dx folded), f32 accumulation.
    acc = jnp.dot(x[0:TH * Wp], w_ref[0], preferred_element_type=jnp.float32)
    acc += jnp.dot(x[Wp:(TH + 1) * Wp], w_ref[1], preferred_element_type=jnp.float32)
    acc += jnp.dot(x[2 * Wp:(TH + 2) * Wp], w_ref[2], preferred_element_type=jnp.float32)

    # Fused (inference) BatchNorm affine + ReLU.
    y = jnp.maximum(acc * scale_ref[0] + bias_ref[0], 0.0)

    if apply_dropout:
        # Counter-based hash PRNG: plain int32 VPU ops, keyed on (seed, grid step,
        # element index) -> order-independent across the grid.
        M = TH * Wp
        step = pl.program_id(0) * pl.num_programs(1) + pl.program_id(1)
        rows = jax.lax.broadcasted_iota(jnp.int32, (M, Cp), 0).astype(jnp.uint32)
        cols = jax.lax.broadcasted_iota(jnp.int32, (M, Cp), 1).astype(jnp.uint32)
        base = (step.astype(jnp.uint32) * jnp.uint32((M * Cp) & 0xFFFFFFFF)
                + seed_ref[0].astype(jnp.uint32) * jnp.uint32(0x9E3779B9))
        h = base + rows * jnp.uint32(Cp) + cols
        # Trimmed 2-round mix (cheaper than full fmix32; plenty for dropout).
        h = h * jnp.uint32(0x9E3779B1)
        h = h ^ (h >> 16)
        h = h * jnp.uint32(0x85EBCA6B)
        h = h ^ (h >> 13)
        u24 = (h >> 8).astype(jnp.int32)             # uniform in [0, 2^24)
        keep = u24 >= jnp.int32(drop_threshold)      # 1/(1-rate) folded into scale/bias
        y = jnp.where(keep, y, 0.0)

    o_ref[0, 0] = y.reshape(TH, Wp, Cp).astype(o_ref.dtype)


def vgg16_conv_block_forward(x, params, *, rate=0.4, drop=True, training=False,
                             seed=0, eps=1e-5, block_h=None,
                             compute_dtype=jnp.bfloat16, out_dtype=jnp.bfloat16,
                             data_format="NCHW"):
    """Forward pass matching vgg16_conv_block. data_format: 'NCHW' (default) or 'NHWC'."""
    w_oihw = params["conv_w"]          # (Cout, Cin, 3, 3)
    conv_b = params["conv_b"]          # (Cout,)
    gamma = params["bn_gamma"]         # (Cout,)
    beta = params["bn_beta"]           # (Cout,)
    mean = params["bn_mean"]           # (Cout,)
    var = params["bn_var"]             # (Cout,)

    if data_format == "NCHW":
        x_nhwc = jnp.transpose(x, (0, 2, 3, 1))
    elif data_format == "NHWC":
        x_nhwc = x
    else:
        raise ValueError(f"unsupported data_format {data_format!r}")

    N, H, W, Cin = x_nhwc.shape
    Cout = w_oihw.shape[0]
    in_bytes = jnp.dtype(compute_dtype).itemsize
    out_bytes = jnp.dtype(out_dtype).itemsize
    sub = 16 if in_bytes == 2 else 8   # sublane tile (packed for 2-byte dtypes)

    K = 3 * Cin
    Kp = _round_up(K, sub)             # contraction dim padded to the sublane tile
    Cp = _round_up(Cout, 128)          # output channels padded to the lane tile
    Wp = _round_up(W, sub)             # width padded so dy-tap slices stay aligned

    apply_dropout = bool(drop and training and float(rate) > 0.0)

    budget, vmem_limit = _device_budgets()
    if block_h is None:
        # Keep at least 2 grid steps when N == 1 so a megacore never idles a core.
        max_th = H if (N >= 2 or H == 1) else max(1, H // 2)
        block_h = _pick_block_h(H, Wp, Kp, Cp, in_bytes=in_bytes, out_bytes=out_bytes,
                                budget=budget,
                                f32_tmp_copies=(4 if apply_dropout else 2),
                                max_th=max_th)
    TH = int(block_h)
    assert H % TH == 0, "block_h must divide H"
    nH = H // TH

    # ---- layout marshalling (single fused XLA pass, all in compute_dtype) --------
    # Pad H by 1 each side and W up to Wp (+ conv padding), fold the 3 dx shifts into
    # channels, pad K; halo windows only when nH > 1 (and then with large TH).
    xt = x_nhwc.astype(compute_dtype)                                   # bf16 early
    xt = jnp.pad(xt, ((0, 0), (1, 1), (1, Wp - W + 1), (0, 0)))         # (N,H+2,Wp+2,Cin)
    xt = jnp.concatenate([xt[:, :, 0:Wp], xt[:, :, 1:Wp + 1],
                          xt[:, :, 2:Wp + 2]], axis=-1)                 # (N,H+2,Wp,3*Cin)
    if Kp > K:
        xt = jnp.pad(xt, ((0, 0), (0, 0), (0, 0), (0, Kp - K)))
    if nH == 1:
        xt = xt[:, None]                                                # (N,1,H+2,Wp,Kp)
    else:
        xt = jnp.stack([xt[:, h * TH:h * TH + TH + 2] for h in range(nH)],
                       axis=1)                                          # (N,nH,TH+2,Wp,Kp)

    # OIHW -> (dy, dx*Cin+ci, co), padded to (3, Kp, Cp).
    w2 = jnp.transpose(w_oihw, (2, 3, 1, 0)).reshape(3, K, Cout).astype(jnp.float32)
    w2 = jnp.pad(w2, ((0, 0), (0, Kp - K), (0, Cp - Cout))).astype(compute_dtype)

    # Fold BatchNorm (inference) + conv bias into per-channel scale/bias.
    scale = (gamma / jnp.sqrt(var + eps)).astype(jnp.float32)
    bias = (beta + (conv_b - mean) * scale).astype(jnp.float32)
    if apply_dropout:
        keep_scale = 1.0 / (1.0 - float(rate))      # ReLU commutes with a positive scale
        scale = scale * keep_scale
        bias = bias * keep_scale
    scale = jnp.pad(scale, (0, Cp - Cout)).reshape(1, Cp)
    bias = jnp.pad(bias, (0, Cp - Cout)).reshape(1, Cp)

    seed_arr = jnp.asarray([seed], dtype=jnp.int32)
    drop_threshold = int(float(rate) * (1 << 24))

    kernel = functools.partial(_conv_bn_relu_drop_kernel,
                               apply_dropout=apply_dropout,
                               drop_threshold=drop_threshold)

    cost = pl.CostEstimate(
        flops=2 * N * H * W * 9 * Cin * Cout,
        transcendentals=0,
        bytes_accessed=int(xt.size * in_bytes + w2.size * in_bytes
                           + N * H * Wp * Cp * out_bytes + 2 * Cp * 4 + 4))

    out = pl.pallas_call(
        kernel,
        out_shape=jax.ShapeDtypeStruct((N, nH, TH, Wp, Cp), out_dtype),
        grid_spec=pltpu.PrefetchScalarGridSpec(
            num_scalar_prefetch=0,
            grid=(N, nH),
            in_specs=[
                pl.BlockSpec(memory_space=pltpu.MemorySpace.SMEM),               # seed
                pl.BlockSpec((1, 1, TH + 2, Wp, Kp),
                             lambda n, h: (n, h, 0, 0, 0)),                      # x tiles
                pl.BlockSpec((3, Kp, Cp), lambda n, h: (0, 0, 0)),               # weights
                pl.BlockSpec((1, Cp), lambda n, h: (0, 0)),                      # scale
                pl.BlockSpec((1, Cp), lambda n, h: (0, 0)),                      # bias
            ],
            out_specs=pl.BlockSpec((1, 1, TH, Wp, Cp), lambda n, h: (n, h, 0, 0, 0)),
        ),
        compiler_params=pltpu.CompilerParams(
            dimension_semantics=("parallel", "parallel"),
            vmem_limit_bytes=vmem_limit),
        cost_estimate=cost,
    )(seed_arr, xt, w2, scale, bias)

    out = out.reshape(N, H, Wp, Cp)[:, :, :W, :Cout]   # drop W / channel padding
    if data_format == "NCHW":
        out = jnp.transpose(out, (0, 3, 1, 2))          # NHWC -> NCHW
    return out


def _reference_eval(x_nchw, params, eps=1e-5, compute_dtype=jnp.bfloat16):
    """Pure-JAX reference (eval mode). Inputs/weights quantized to compute_dtype to
    mirror the kernel's bf16-in / f32-accumulate matmuls."""
    xc = x_nchw.astype(compute_dtype).astype(jnp.float32)
    w = params["conv_w"].astype(compute_dtype).astype(jnp.float32)
    y = jax.lax.conv_general_dilated(
        xc, w, window_strides=(1, 1), padding=((1, 1), (1, 1)),
        dimension_numbers=("NCHW", "OIHW", "NCHW"))
    y = y + params["conv_b"][None, :, None, None]
    inv = 1.0 / jnp.sqrt(params["bn_var"] + eps)
    y = (y - params["bn_mean"][None, :, None, None]) * inv[None, :, None, None]
    y = y * params["bn_gamma"][None, :, None, None] + params["bn_beta"][None, :, None, None]
    return jnp.maximum(y, 0.0)


if __name__ == "__main__":
    key = jax.random.PRNGKey(0)
    N, Cin, H, W = 2, 4, 16, 16
    Cout = 8
    rate = 0.4

    k_x, k_w, k_b, k_g, k_be, k_m, k_v = jax.random.split(key, 7)
    x = jax.random.normal(k_x, (N, Cin, H, W), dtype=jnp.float32)
    params = {
        "conv_w": jax.random.normal(k_w, (Cout, Cin, 3, 3), dtype=jnp.float32) * 0.1,
        "conv_b": jax.random.normal(k_b, (Cout,), dtype=jnp.float32) * 0.1,
        "bn_gamma": 1.0 + 0.1 * jax.random.normal(k_g, (Cout,), dtype=jnp.float32),
        "bn_beta": 0.1 * jax.random.normal(k_be, (Cout,), dtype=jnp.float32),
        "bn_mean": 0.1 * jax.random.normal(k_m, (Cout,), dtype=jnp.float32),
        "bn_var": jnp.abs(1.0 + 0.1 * jax.random.normal(k_v, (Cout,), dtype=jnp.float32)),
    }

    ref = _reference_eval(x, params)

    # Eval mode, explicit row tiling (exercises the halo-window path, grid=(2,2)), f32 out.
    out_f32 = vgg16_conv_block_forward(x, params, rate=rate, drop=True, training=False,
                                       block_h=8, out_dtype=jnp.float32)
    out_f32 = jax.block_until_ready(out_f32)
    assert out_f32.shape == (N, Cout, H, W)
    assert jnp.allclose(out_f32, ref, atol=2e-3, rtol=2e-3), "tiled mismatch vs reference"

    # Eval mode, auto tile + default bf16 output (exercises the nH==1, no-stack path).
    out_auto = vgg16_conv_block_forward(x, params, rate=rate, drop=True, training=False)
    out_auto = jax.block_until_ready(out_auto)
    assert jnp.allclose(out_auto.astype(jnp.float32), ref, atol=3e-2, rtol=3e-2), \
        "auto-tile bf16 mismatch vs reference"

    # NHWC in/out path (layout plumbing for chained blocks).
    out_nhwc = vgg16_conv_block_forward(jnp.transpose(x, (0, 2, 3, 1)), params,
                                        rate=rate, drop=True, training=False,
                                        out_dtype=jnp.float32, data_format="NHWC")
    out_nhwc = jax.block_until_ready(out_nhwc)
    assert jnp.allclose(out_nhwc, jnp.transpose(ref, (0, 2, 3, 1)),
                        atol=2e-3, rtol=2e-3), "NHWC mismatch vs reference"

    # Training mode: exercises the in-kernel (hash-PRNG) inverted dropout path.
    out_train = vgg16_conv_block_forward(x, params, rate=rate, drop=True, training=True,
                                         seed=1234, block_h=8, out_dtype=jnp.float32)
    out_train = jax.block_until_ready(out_train)
    assert out_train.shape == (N, Cout, H, W)
    assert bool(jnp.all(jnp.isfinite(out_train)))
    # Kept activations must equal eval activations scaled by 1/(1-rate).
    scaled = out_f32 / (1.0 - rate)
    err = jnp.where(out_train > 0, jnp.abs(out_train - scaled), 0.0)
    assert float(jnp.max(err)) < 1e-2, "kept dropout values do not match scaled eval values"
    zero_frac_eval = float(jnp.mean(out_f32 == 0.0))
    zero_frac_train = float(jnp.mean(out_train == 0.0))
    assert zero_frac_train > zero_frac_eval + 0.05, "dropout did not zero activations"

    print("KERNEL_OK")
</pallas_src>

<mosaic_0001>
module attributes {stable_mosaic.version = 11 : i64} {
  func.func @_conv_bn_relu_drop_kernel(%arg0: i32, %arg1: i32, %arg2: memref<1xi32, #tpu.memory_space<smem>>, %arg3: memref<1x1x10x16x16xbf16, #tpu.memory_space<vmem>>, %arg4: memref<3x16x128xbf16, #tpu.memory_space<vmem>>, %arg5: memref<1x128xf32, #tpu.memory_space<vmem>>, %arg6: memref<1x128xf32, #tpu.memory_space<vmem>>, %arg7: memref<1x1x8x16x128xf32, #tpu.memory_space<vmem>>) attributes {dimension_semantics = [#tpu.dimension_semantics<parallel>, #tpu.dimension_semantics<parallel>], iteration_bounds = array<i64: 2, 2>, scalar_prefetch = 0 : i64, scratch_operands = 0 : i64, tpu.core_type = #tpu.core_type<tc>, window_params = [{transform_indices = @transform_0, window_bounds = array<i64: 1>}, {transform_indices = @transform_1, window_bounds = array<i64: 1, 1, 10, 16, 16>}, {pipeline_mode = #tpu.pipeline_mode<synchronous>, transform_indices = @transform_2, window_bounds = array<i64: 3, 16, 128>}, {pipeline_mode = #tpu.pipeline_mode<synchronous>, transform_indices = @transform_3, window_bounds = array<i64: 1, 128>}, {pipeline_mode = #tpu.pipeline_mode<synchronous>, transform_indices = @transform_4, window_bounds = array<i64: 1, 128>}, {transform_indices = @transform_5, window_bounds = array<i64: 1, 1, 8, 16, 128>}]} {
    %c0 = arith.constant 0 : index
    %c0_0 = arith.constant 0 : index
    %c0_1 = arith.constant 0 : index
    %c0_2 = arith.constant 0 : index
    %c0_3 = arith.constant 0 : index
    %0 = vector.load %arg3[%c0, %c0_0, %c0_1, %c0_2, %c0_3] : memref<1x1x10x16x16xbf16, #tpu.memory_space<vmem>>, vector<1x1x10x16x16xbf16>
    %1 = vector.shape_cast %0 : vector<1x1x10x16x16xbf16> to vector<10x16x16xbf16>
    %2 = vector.shape_cast %1 : vector<10x16x16xbf16> to vector<160x16xbf16>
    %3 = vector.extract_strided_slice %2 {offsets = [0, 0], sizes = [128, 16], strides = [1, 1]} : vector<160x16xbf16> to vector<128x16xbf16>
    %c0_4 = arith.constant 0 : index
    %c0_5 = arith.constant 0 : index
    %c0_6 = arith.constant 0 : index
    %4 = vector.load %arg4[%c0_4, %c0_5, %c0_6] : memref<3x16x128xbf16, #tpu.memory_space<vmem>>, vector<1x16x128xbf16>
    %5 = vector.shape_cast %4 : vector<1x16x128xbf16> to vector<16x128xbf16>
    %cst = arith.constant dense<0.000000e+00> : vector<128x128xf32>
    %6 = tpu.matmul %3, %5, %cst {dimension_numbers = #tpu.dot_dimension_numbers<[1], [0], [0], [1], [0, 0, 1, 1], [], []>} : vector<128x16xbf16>, vector<16x128xbf16>, vector<128x128xf32> -> vector<128x128xf32>
    %7 = vector.extract_strided_slice %2 {offsets = [16, 0], sizes = [128, 16], strides = [1, 1]} : vector<160x16xbf16> to vector<128x16xbf16>
    %c1 = arith.constant 1 : index
    %c0_7 = arith.constant 0 : index
    %c0_8 = arith.constant 0 : index
    %8 = vector.load %arg4[%c1, %c0_7, %c0_8] : memref<3x16x128xbf16, #tpu.memory_space<vmem>>, vector<1x16x128xbf16>
    %9 = vector.shape_cast %8 : vector<1x16x128xbf16> to vector<16x128xbf16>
    %cst_9 = arith.constant dense<0.000000e+00> : vector<128x128xf32>
    %10 = tpu.matmul %7, %9, %cst_9 {dimension_numbers = #tpu.dot_dimension_numbers<[1], [0], [0], [1], [0, 0, 1, 1], [], []>} : vector<128x16xbf16>, vector<16x128xbf16>, vector<128x128xf32> -> vector<128x128xf32>
    %11 = arith.addf %6, %10 : vector<128x128xf32>
    %12 = vector.extract_strided_slice %2 {offsets = [32, 0], sizes = [128, 16], strides = [1, 1]} : vector<160x16xbf16> to vector<128x16xbf16>
    %c2 = arith.constant 2 : index
    %c0_10 = arith.constant 0 : index
    %c0_11 = arith.constant 0 : index
    %13 = vector.load %arg4[%c2, %c0_10, %c0_11] : memref<3x16x128xbf16, #tpu.memory_space<vmem>>, vector<1x16x128xbf16>
    %14 = vector.shape_cast %13 : vector<1x16x128xbf16> to vector<16x128xbf16>
    %cst_12 = arith.constant dense<0.000000e+00> : vector<128x128xf32>
    %15 = tpu.matmul %12, %14, %cst_12 {dimension_numbers = #tpu.dot_dimension_numbers<[1], [0], [0], [1], [0, 0, 1, 1], [], []>} : vector<128x16xbf16>, vector<16x128xbf16>, vector<128x128xf32> -> vector<128x128xf32>
    %16 = arith.addf %11, %15 : vector<128x128xf32>
    %c0_13 = arith.constant 0 : index
    %c0_14 = arith.constant 0 : index
    %17 = vector.load %arg5[%c0_13, %c0_14] : memref<1x128xf32, #tpu.memory_space<vmem>>, vector<1x128xf32>
    %18 = vector.shape_cast %17 : vector<1x128xf32> to vector<128xf32>
    %19 = vector.shape_cast %18 : vector<128xf32> to vector<1x128xf32>
    %20 = vector.broadcast %19 : vector<1x128xf32> to vector<128x128xf32>
    %21 = arith.mulf %16, %20 : vector<128x128xf32>
    %c0_15 = arith.constant 0 : index
    %c0_16 = arith.constant 0 : index
    %22 = vector.load %arg6[%c0_15, %c0_16] : memref<1x128xf32, #tpu.memory_space<vmem>>, vector<1x128xf32>
    %23 = vector.shape_cast %22 : vector<1x128xf32> to vector<128xf32>
    %24 = vector.shape_cast %23 : vector<128xf32> to vector<1x128xf32>
    %25 = vector.broadcast %24 : vector<1x128xf32> to vector<128x128xf32>
    %26 = arith.addf %21, %25 : vector<128x128xf32>
    %cst_17 = arith.constant 0.000000e+00 : f32
    %27 = vector.broadcast %cst_17 : f32 to vector<128x128xf32>
    %28 = arith.maximumf %26, %27 : vector<128x128xf32>
    %29 = vector.shape_cast %28 : vector<128x128xf32> to vector<8x16x128xf32>
    %c0_18 = arith.constant 0 : index
    %c0_19 = arith.constant 0 : index
    %c0_20 = arith.constant 0 : index
    %c0_21 = arith.constant 0 : index
    %c0_22 = arith.constant 0 : index
    %30 = vector.load %arg7[%c0_18, %c0_19, %c0_20, %c0_21, %c0_22] : memref<1x1x8x16x128xf32, #tpu.memory_space<vmem>>, vector<1x1x8x16x128xf32>
    %31 = vector.shape_cast %30 : vector<1x1x8x16x128xf32> to vector<8x16x128xf32>
    %32 = vector.shape_cast %29 : vector<8x16x128xf32> to vector<1x1x8x16x128xf32>
    tpu.vector_store %arg7[%c0_18, %c0_19, %c0_20, %c0_21, %c0_22], %32 {strides = array<i32>} : memref<1x1x8x16x128xf32, #tpu.memory_space<vmem>>, vector<1x1x8x16x128xf32>,
    return
  }
  func.func @transform_0(%arg0: i32, %arg1: i32) -> i32 {
    %c0_i32 = arith.constant 0 : i32
    %c0_i32_0 = arith.constant 0 : i32
    return %c0_i32 : i32
  }
  func.func @transform_1(%arg0: i32, %arg1: i32) -> (i32, i32, i32, i32, i32) {
    %c0_i32 = arith.constant 0 : i32
    %c0_i32_0 = arith.constant 0 : i32
    %c0_i32_1 = arith.constant 0 : i32
    %c0_i32_2 = arith.constant 0 : i32
    return %arg0, %arg1, %c0_i32, %c0_i32_0, %c0_i32_1 : i32, i32, i32, i32, i32
  }
  func.func @transform_2(%arg0: i32, %arg1: i32) -> (i32, i32, i32) {
    %c0_i32 = arith.constant 0 : i32
    %c0_i32_0 = arith.constant 0 : i32
    %c0_i32_1 = arith.constant 0 : i32
    %c0_i32_2 = arith.constant 0 : i32
    return %c0_i32, %c0_i32_0, %c0_i32_1 : i32, i32, i32
  }
  func.func @transform_3(%arg0: i32, %arg1: i32) -> (i32, i32) {
    %c0_i32 = arith.constant 0 : i32
    %c0_i32_0 = arith.constant 0 : i32
    %c0_i32_1 = arith.constant 0 : i32
    return %c0_i32, %c0_i32_0 : i32, i32
  }
  func.func @transform_4(%arg0: i32, %arg1: i32) -> (i32, i32) {
    %c0_i32 = arith.constant 0 : i32
    %c0_i32_0 = arith.constant 0 : i32
    %c0_i32_1 = arith.constant 0 : i32
    return %c0_i32, %c0_i32_0 : i32, i32
  }
  func.func @transform_5(%arg0: i32, %arg1: i32) -> (i32, i32, i32, i32, i32) {
    %c0_i32 = arith.constant 0 : i32
    %c0_i32_0 = arith.constant 0 : i32
    %c0_i32_1 = arith.constant 0 : i32
    %c0_i32_2 = arith.constant 0 : i32
    return %arg0, %arg1, %c0_i32, %c0_i32_0, %c0_i32_1 : i32, i32, i32, i32, i32
  }
}

</mosaic_0001>

<bundles_post_ra>
// kernel: tpu_custom_call.1
= control target key start
LH: loop header
LB: loop body
LE: loop exit
PB: predicated region body
PF: predicated region fallthrough
CT: control target
= control target key end

     0   :  { %s1448_s0 = inlined_call_operand.<no memory space> [shape: s32[1], index: 0, kind: input, shape index: {}]   ;;  %s1449_s1 = inlined_call_operand.hbm [shape: bf16[2,2,10,16,16], index: 1, kind: input, shape index: {}]   ;;  %s1450_s2 = inlined_call_operand.hbm [shape: bf16[3,16,128], index: 2, kind: input, shape index: {}]   ;;  %s1451_s3 = inlined_call_operand.vmem [shape: f32[1,128], index: 3, kind: input, shape index: {}]   ;;  %s1452_s4 = inlined_call_operand.vmem [shape: f32[1,128], index: 4, kind: input, shape index: {}]   ;;  %s1453_s5 = inlined_call_operand.hbm [shape: f32[2,2,8,16,128], index: 5, kind: output, shape index: {}]  }
   0x1   :  { %1465 = sst [smem:[#allocation19_spill]] %s1450_s2 }
   0x2   :  { %11 = vsyncpa [#allocation4], 0 }
   0x3   :  { %13 = vsyncpa [#allocation4 + $0x1], 0 }
   0x4   :  { %14 = vsyncpa [#allocation7], 0 }
   0x5   :  { %15 = vsyncpa [#allocation5], 0 }
   0x6   :  { %17 = vsyncpa [#allocation5 + $0x1], 0  ;;  %s1167_s0 = smov 0   ;;  %s1169_s18 = smov 0  }
   0x7   :  { %s1171_s19 = smov 0   ;;  %s1173_s20 = smov 0  }
   0x8   :  { %s1175_s21 = smov 0   ;;  %s1177_s22 = smov 0  }
   0x9   :  { %s1179_s23 = smov 0   ;;  %s1181_s24 = smov 0  }
   0xa LB: > { %1466 = sst [smem:[#allocation12_spill]] %s1102_s0  ;;  %s762_s25 = sadd.s32 4294967295, %s1130_s24   ;;  %s1130_s24 = sphi %s1181_s24, %s23_s24   ;;  %s1126_s23 = sphi %s1179_s23, %s1493_s23   ;;  %s1122_s22 = sphi %s1177_s22, %s1487_s22   ;;  %s1118_s21 = sphi %s1175_s21, %s1492_s21   ;;  %s1114_s20 = sphi %s1173_s20, %s1486_s20   ;;  %s1110_s19 = sphi %s1171_s19, %s1491_s19   ;;  %s1106_s18 = sphi %s1169_s18, %s1490_s18   ;;  %s1102_s0 = sphi %s1167_s0, %s1489_s0  }
   0xb   : > { %1467 = sst [smem:[#allocation13_spill]] %s1122_s22  ;;  %s763_s26 = sadd.s32 4294967294, %s1130_s24  }
   0xc   : > { %1468 = sst [smem:[#allocation14_spill]] %s1130_s24  ;;  %p78_p0 = scmp.ne.s32.totalorder %s1106_s18, %s1102_s0 }
   0xd   : > { %p1211_p1 = scmp.eq.s32.totalorder %s762_s25, 0  ;;  %p1215_p2 = scmp.eq.s32.totalorder %s762_s25, 3 }
   0xe   : > { %p173_p3 = scmp.eq.s32.totalorder %s763_s26, 3  ;;  %p764_p5 = scmp.ge.s32.totalorder %s1130_s24, 1 }
   0xf   : > { %p1221_p4 = por %p1211_p1, %p78_p0  ;;  %p180_p7 = scmp.lt.s32.totalorder %s1130_s24, 5 }
  0x10   : > { %p1226_p6 = por %p173_p3, %p78_p0  ;;  %s1474_s2 = sld [smem:[#allocation19_spill]] }
  0x11   : > { %p1234_p8 = pnand %p764_p5, %p180_p7  ;;  %s1132_s10 = smov [#allocation6]  }
  0x12   : > { %s1472_s30 = scalar_select %p1226_p6, 1, 0 }
  0x13   : > { %p881_p9 = pneg %p1234_p8  ;;  %s196_s11 = sshll.u32 %s1132_s10, 4  ;;  %s197_s11 = int_to_ptr.vmem [resolvable:$true] %s196_s11 }
  0x14   : > { %1473 = sst [smem:[#allocation15_spill]] %s1472_s30  ;;  %s1454_s12 = smov 64  }
  0x15   : > { %p882_p10 = pnand %p881_p9, %p1211_p1  ;;  %s1455_s13 = smov 4  }
  0x16   : > { %s194_s8 = sshll.u32 %s1474_s2, 4  ;;  %s32_s14 = sadd.s32 1, %s1122_s22  ;;  %s195_s8 = int_to_ptr.hbm [resolvable:$true] %s194_s8 }
  0x17   : > { %884 = dma.hbm_to_vmem [thread:$0]  (!%p882_p10), %s195_s8, 384, %s197_s11, [#allocation7], %s1454_s12, %s1454_s12, %s1455_s13  }
  0x18   : > { %p33_p11 = scmp.ge.s32.totalorder %s32_s14, 2  ;;  %s35_s15 = sadd.s32 1, %s1126_s23 }
  0x19   : > { %s65_s16 = sadd.s32 1, %s1110_s19  ;;  %p72_p12 = scmp.ne.s32.totalorder %s1110_s19, %s1106_s18 }
  0x1a   : > { %s1495_s14 = smov (%p33_p11, %s32_s14), 0  ;;  %s1497_s15 = smov (!%p33_p11, %s35_s15), %s1126_s23 }
  0x1b   : > { %1476 = sst [smem:[#allocation16_spill]] %s1495_s14  ;;  %s61_s17 = ssub.s32 %s1122_s22, %s1495_s14 }
  0x1c   : > { %p73_p13 = scmp.eq.s32.totalorder %s1130_s24, 0  ;;  %p37_p0 = scmp.ge.s32.totalorder %s1497_s15, 2 }
  0x1d   : > { %p1258_p3 = por %p1215_p2, %p72_p12  ;;  %p894_p7 = scmp.lt.s32.totalorder %s1130_s24, 4 }
  0x1e   : > { %p74_p5 = por %p73_p13, %p72_p12  ;;  %s1499_s15 = smov (%p37_p0, %s1497_s15), 0 }
  0x1f   : > { %s1477_s25 = scalar_select %p1258_p3, 1, 0 }
  0x20   : > { %1479 = sst [smem:[#allocation18_spill]] %s1499_s15  ;;  %s216_s26 = sand.u32 1, %s1110_s19  }
  0x21   : > { %1478 = sst [smem:[#allocation17_spill]] %s1477_s25  ;;  %s870_s6 = smul.u32 20, %s1122_s22 }
  0x22   : > { %s60_s7 = ssub.s32 %s1126_s23, %s1499_s15  ;;  %s869_s10 = smul.u32 80, %s216_s26 }
  0x23   : > { %s62_s8 = sor.u32 %s61_s17, %s60_s7  ;;  %s871_s11 = smul.u32 40, %s1126_s23 }
  0x24   : > { %p63_p9 = scmp.eq.s32.totalorder %s62_s8, 0  ;;  %p886_p10 = pnand %p894_p7, %p74_p5 }
  0x25   : > { %s225_s28 = sadd.s32 %s871_s11, %s870_s6  ;;  %s220_s13 = scalar_lea.vmem [#allocation3], %s869_s10 }
  0x26   : > { %s1271_s12 = scalar_select %p63_p9, %s1110_s19, %s65_s16  }
  0x27   : > { %s230_s2 = sshll.u32 %s220_s13, 4  ;;  %s767_s14 = sshll.u32 %s225_s28, 2  ;;  %s231_s2 = int_to_ptr.vmem [resolvable:$true] %s230_s2 }
  0x28   : > { %s227_s24 = scalar_lea.hbm %s1449_s1, %s767_s14  ;;  %s217_s22 = scalar_lea.sflag [#allocation4], %s216_s26 }
  0x29   : > { %s228_s25 = sshll.u32 %s227_s24, 4  ;;  %s1480_s15 = smov 4   ;;  %s229_s25 = int_to_ptr.hbm [resolvable:$true] %s228_s25 }
  0x2a   : > { %s1481_s17 = smov 64   ;;  %242 = sbr.rel (%p1234_p8) target bundleno = 289 (0x121), region = 40 }
  0x2b   : > { %888 = dma.hbm_to_vmem [thread:$0]  (!%p886_p10), %s229_s25, 1280, %s231_s2, %s217_s22, %s1481_s17, %s1481_s17, %s1480_s15  }
  0x2c   : > { %s1282_s16 = sand.u32 (!%p1234_p8), 1, %s1106_s18  }
  0x2d   : > { %s872_s13 = smul.u32 (!%p1234_p8), 80, %s1282_s16  ;;  %s245_s6 = scalar_lea.sflag (!%p1234_p8), [#allocation4], %s1282_s16 }
  0x2f   : > { %s1286_s0 = scalar_lea.vmem [#allocation3], %s872_s13 }
  0x30   : > { %1089 = dma.done.wait (%p1221_p4), %s245_s6, 1280  }
  0x31   : > { %1091 = vsyncadd (%p1221_p4), %s245_s6, 4294966016 }
  0x32   : > { %1093 = dma.done.wait (%p1211_p1), [#allocation7], 384  }
  0x33   : > { %1095 = vsyncadd (%p1211_p1), [#allocation7], 4294966912  ;;  %v864_v0 = vld [vmem:[#allocation6 + $0x8] sm:$0xff]  ;;  %v863_v1 = vld [vmem:[#allocation6] sm:$0xff]  ;;  %vm353_vm0 = vcmask 130048   ;;  %s770_s29 = sshll.u32 %s1282_s16, 7 }
  0x34   : > { %v865_v2 = vld [vmem:[#allocation6 + $0x10] sm:$0xff]  ;;  %v854_v3 = vld [vmem:[%s1286_s0 + $0x8] sm:$0xff]  ;;  %v860_v4 = vld [vmem:[%s1286_s0 + $0x38] sm:$0xff]  ;;  %385 = vmatpush.bf16.msra.mxu0 %v864_v0  ;;  %866 = vmatpush.bf16.msra.mxu3 %v864_v0  ;;  %s1347_s30 = scalar_lea.vmem [#allocation8], %s770_s29  ;;  %s848_s9 = sshll.u32 %s1114_s20, 4 }
  0x35   : > { %v853_v5 = vld [vmem:[%s1286_s0] sm:$0xff]  ;;  %v855_v6 = vld [vmem:[%s1286_s0 + $0x10] sm:$0xff]  ;;  %448 = vmatpush.bf16.msra.mxu1 %v863_v1  ;;  %514 = vmatpush.bf16.msra.mxu2 %v865_v2  ;;  %v856_v8 = vld [vmem:[%s1286_s0 + $0x18] sm:$0xff]  ;;  %s849_s14 = sshll.u32 %s1118_s21, 5  ;;  %s659_s8 = sshll.u32 %s1347_s30, 4  ;;  %s660_s8 = int_to_ptr.vmem [resolvable:$true] %s659_s8 }
  0x36   : > { %v861_v7 = vld [vmem:[%s1286_s0 + $0x40] sm:$0xff]  ;;  %v859_v9 = vld [vmem:[%s1286_s0 + $0x30] sm:$0xff]  ;;  %v858_v11 = vld [vmem:[%s1286_s0 + $0x28] sm:$0xff]  ;;  %s656_s15 = sadd.s32 %s849_s14, %s848_s9  ;;  %s645_s11 = scalar_lea.sflag [#allocation5], %s1282_s16 }
  0x37   : > { %807 = vmatmul.msk.bf16.vlgmr.msra.gmra.mxu0 %vm353_vm0, %v854_v3  ;;  %813 = vmatmul.msk.bf16.vlgmr.msra.gmra.mxu3 %vm353_vm0, %v860_v4  ;;  %v857_v10 = vld [vmem:[%s1286_s0 + $0x20] sm:$0xff]  ;;  %v862_v12 = vld [vmem:[%s1286_s0 + $0x48] sm:$0xff]  ;;  %s850_s20 = sshll.u32 %s656_s15, 3  ;;  %s1048_s0 = scalar_lea.hbm %s1453_s5, 512 }
  0x38   : > { %867 = vmatpush.bf16.msrb.mxu3 %v863_v1  ;;  %823 = vmatmul.msk.bf16.vlgmr.msra.gmra.mxu1 %vm353_vm0, %v853_v5  ;;  %v1335_v17 = vld [vmem:[%s1451_s3] ss:$0 sm:$0xff]  ;;  %s658_s26 = scalar_lea.hbm %s1453_s5, %s850_s20 }
  0x39   : > { %839 = vmatmul.msk.bf16.vlgmr.msra.gmra.mxu2 %vm353_vm0, %v855_v6  ;;  %v1340_v20 = vld [vmem:[%s1452_s4] ss:$0 sm:$0xff]  ;;  %s661_s10 = sshll.u32 %s658_s26, 4  ;;  %s662_s10 = int_to_ptr.hbm [resolvable:$true] %s661_s10 }
  0x3a   : > { %s1042_s28 = sshra.s32 %s662_s10, 4  ;;  %s1043_s28 = int_to_ptr.hbm [resolvable:$true] %s1042_s28 }
  0x3b   : > { %s1044_s17 = scalar_lea.hbm %s1043_s28, 128  ;;  %p1049_p8 = scmp.lt.s32.totalorder %s1043_s28, %s1453_s5 }
  0x3c   : > { %868 = vmatpush.bf16.msra.mxu3 %v865_v2  ;;  %p1045_p1 = scmp.ne.s32.totalorder %s1043_s28, %s1044_s17  ;;  %p1050_p11 = scmp.lt.s32.totalorder %s1048_s0, %s1044_s17 }
  0x3e   : > { %p1046_p2 = pnand %p1045_p1, %p1258_p3  ;;  %p1051_p12 = por %p1050_p11, %p1049_p8 }
  0x40   : > { %p1047_p4 = pneg %p1046_p2 }
  0x42   : > { %p1052_p13 = pnand %p1051_p12, %p1047_p4 }
  0x47   : > { %808 = vmatmul.msk.bf16.gmra.mxu0 %vm353_vm0, %v855_v6  ;;  %814 = vmatmul.msk.bf16.gmra.mxu3 %vm353_vm0, %v861_v7 }
  0x48   : > { %824 = vmatmul.msk.bf16.gmra.mxu1 %vm353_vm0, %v854_v3 }
  0x49   : > { %840 = vmatmul.msk.bf16.gmra.mxu2 %vm353_vm0, %v856_v8 }
  0x57   : > { %809 = vmatmul.msk.bf16.gmra.mxu0 %vm353_vm0, %v856_v8  ;;  %829 = vmatmul.msk.bf16.vlgmr.msrb.gmra.mxu3 %vm353_vm0, %v859_v9 }
  0x58   : > { %825 = vmatmul.msk.bf16.gmra.mxu1 %vm353_vm0, %v855_v6 }
  0x59   : > { %841 = vmatmul.msk.bf16.gmra.mxu2 %vm353_vm0, %v857_v10 }
  0x67   : > { %810 = vmatmul.msk.bf16.gmra.mxu0 %vm353_vm0, %v857_v10  ;;  %830 = vmatmul.msk.bf16.gmra.mxu3 %vm353_vm0, %v860_v4 }
  0x68   : > { %826 = vmatmul.msk.bf16.gmra.mxu1 %vm353_vm0, %v856_v8 }
  0x69   : > { %842 = vmatmul.msk.bf16.gmra.mxu2 %vm353_vm0, %v858_v11 }
  0x77   : > { %811 = vmatmul.msk.bf16.gmra.mxu0 %vm353_vm0, %v858_v11  ;;  %845 = vmatmul.msk.bf16.vlgmr.msra.gmra.mxu3 %vm353_vm0, %v861_v7 }
  0x78   : > { %827 = vmatmul.msk.bf16.gmra.mxu1 %vm353_vm0, %v857_v10 }
  0x79   : > { %843 = vmatmul.msk.bf16.gmra.mxu2 %vm353_vm0, %v859_v9 }
  0x87   : > { %812 = vmatmul.msk.bf16.gmra.mxu0 %vm353_vm0, %v859_v9  ;;  %846 = vmatmul.msk.bf16.gmra.mxu3 %vm353_vm0, %v862_v12 }
  0x88   : > { %828 = vmatmul.msk.bf16.gmra.mxu1 %vm353_vm0, %v858_v11 }
  0x89   : > { %844 = vmatmul.msk.bf16.gmra.mxu2 %vm353_vm0, %v860_v4 }
  0xb4   : > { %v387_v13 = vpop.f32.mrf.mxu0 }
  0xb5   : > { %v450_v14 = vpop.f32.mrf.mxu1 }
  0xb6   : > { %v451_v15 = vadd.f32 %v450_v14, %v387_v13 }
  0xba   : > { %v1330_v16 = vpop.f32.mrf.mxu3 }
  0xbc   : > { %v516_v18 = vpop.f32.mrf.mxu2  ;;  %v389_v21 = vpop.f32.mrf.mxu0 }
  0xbd   : > { %v556_v19 = vadd.f32 %v516_v18, %v451_v15  ;;  %v452_v22 = vpop.f32.mrf.mxu1 }
  0xbe   : > { %v453_v26 = vadd.f32 %v452_v22, %v389_v21 }
  0xbf   : > { %v576_v23 = vmul.f32 %v1335_v17, %v556_v19 }
  0xc1   : > { %v596_v24 = vadd.f32 %v1340_v20, %v576_v23 }
  0xc2   : > { %v1345_v27 = vpop.f32.mrf.mxu3 }
  0xc3   : > { %v612_v25 = vmax.f32 %v596_v24, 0.0 }
  0xc4   : > { %v518_v28 = vpop.f32.mrf.mxu2  ;;  %v392_v30 = vpop.f32.mrf.mxu0 }
  0xc5   : > { %628 = vst [vmem:[%s1347_s30] sm:$0xff] %v612_v25  ;;  %v557_v29 = vadd.f32 %v518_v28, %v453_v26  ;;  %v455_v31 = vpop.f32.mrf.mxu1 }
  0xc6   : > { %v456_v34 = vadd.f32 %v455_v31, %v392_v30 }
  0xc7   : > { %v577_v32 = vmul.f32 %v1335_v17, %v557_v29 }
  0xc9   : > { %v597_v33 = vadd.f32 %v1340_v20, %v577_v32 }
  0xca   : > { %v1352_v36 = vpop.f32.mrf.mxu3 }
  0xcb   : > { %v613_v35 = vmax.f32 %v597_v33, 0.0 }
  0xcc   : > { %v521_v37 = vpop.f32.mrf.mxu2  ;;  %v394_v39 = vpop.f32.mrf.mxu0 }
  0xcd   : > { %629 = vst [vmem:[%s1347_s30 + $0x8] sm:$0xff] %v613_v35  ;;  %v558_v38 = vadd.f32 %v521_v37, %v456_v34  ;;  %v457_v40 = vpop.f32.mrf.mxu1 }
  0xce   : > { %v458_v44 = vadd.f32 %v457_v40, %v394_v39 }
  0xcf   : > { %v578_v41 = vmul.f32 %v1335_v17, %v558_v38 }
  0xd1   : > { %v598_v42 = vadd.f32 %v1340_v20, %v578_v41 }
  0xd2   : > { %v1357_v45 = vpop.f32.mrf.mxu3 }
  0xd3   : > { %v614_v43 = vmax.f32 %v598_v42, 0.0 }
  0xd4   : > { %v523_v46 = vpop.f32.mrf.mxu2  ;;  %v397_v48 = vpop.f32.mrf.mxu0 }
  0xd5   : > { %630 = vst [vmem:[%s1347_s30 + $0x10] sm:$0xff] %v614_v43  ;;  %v559_v47 = vadd.f32 %v523_v46, %v458_v44  ;;  %v460_v49 = vpop.f32.mrf.mxu1 }
  0xd6   : > { %v461_v52 = vadd.f32 %v460_v49, %v397_v48 }
  0xd7   : > { %v579_v50 = vmul.f32 %v1335_v17, %v559_v47 }
  0xd9   : > { %v599_v51 = vadd.f32 %v1340_v20, %v579_v50 }
  0xda   : > { %v480_v54 = vpop.f32.mrf.mxu3 }
  0xdb   : > { %v615_v53 = vmax.f32 %v599_v51, 0.0  ;;  %v481_v29 = vadd.f32 %v480_v54, %v1330_v16 }
  0xdc   : > { %v526_v55 = vpop.f32.mrf.mxu2  ;;  %v399_v57 = vpop.f32.mrf.mxu0 }
  0xdd   : > { %631 = vst [vmem:[%s1347_s30 + $0x18] sm:$0xff] %v615_v53  ;;  %v560_v56 = vadd.f32 %v526_v55, %v461_v52  ;;  %v462_v58 = vpop.f32.mrf.mxu1 }
  0xde   : > { %v463_v62 = vadd.f32 %v462_v58, %v399_v57 }
  0xdf   : > { %v580_v59 = vmul.f32 %v1335_v17, %v560_v56 }
  0xe1   : > { %v600_v60 = vadd.f32 %v1340_v20, %v580_v59 }
  0xe2   : > { %v482_v63 = vpop.f32.mrf.mxu3 }
  0xe3   : > { %v616_v61 = vmax.f32 %v600_v60, 0.0  ;;  %v483_v16 = vadd.f32 %v482_v63, %v1345_v27 }
  0xe4   : > { %v528_v0 = vpop.f32.mrf.mxu2  ;;  %v402_v2 = vpop.f32.mrf.mxu0 }
  0xe5   : > { %632 = vst [vmem:[%s1347_s30 + $0x20] sm:$0xff] %v616_v61  ;;  %v561_v1 = vadd.f32 %v528_v0, %v463_v62  ;;  %v465_v3 = vpop.f32.mrf.mxu1 }
  0xe6   : > { %v466_v6 = vadd.f32 %v465_v3, %v402_v2 }
  0xe7   : > { %v581_v4 = vmul.f32 %v1335_v17, %v561_v1 }
  0xe9   : > { %v601_v5 = vadd.f32 %v1340_v20, %v581_v4 }
  0xea   : > { %v485_v8 = vpop.f32.mrf.mxu3 }
  0xeb   : > { %v617_v7 = vmax.f32 %v601_v5, 0.0  ;;  %v486_v56 = vadd.f32 %v485_v8, %v1352_v36 }
  0xec   : > { %v531_v9 = vpop.f32.mrf.mxu2  ;;  %v404_v11 = vpop.f32.mrf.mxu0 }
  0xed   : > { %633 = vst [vmem:[%s1347_s30 + $0x28] sm:$0xff] %v617_v7  ;;  %v562_v10 = vadd.f32 %v531_v9, %v466_v6  ;;  %v467_v12 = vpop.f32.mrf.mxu1 }
  0xee   : > { %v468_v18 = vadd.f32 %v467_v12, %v404_v11 }
  0xef   : > { %v582_v13 = vmul.f32 %v1335_v17, %v562_v10 }
  0xf1   : > { %v602_v14 = vadd.f32 %v1340_v20, %v582_v13 }
  0xf2   : > { %v487_v19 = vpop.f32.mrf.mxu3 }
  0xf3   : > { %v618_v15 = vmax.f32 %v602_v14, 0.0  ;;  %v488_v4 = vadd.f32 %v487_v19, %v1357_v45 }
  0xf4   : > { %v533_v21 = vpop.f32.mrf.mxu2  ;;  %v407_v23 = vpop.f32.mrf.mxu0 }
  0xf5   : > { %634 = vst [vmem:[%s1347_s30 + $0x30] sm:$0xff] %v618_v15  ;;  %v563_v22 = vadd.f32 %v533_v21, %v468_v18  ;;  %v470_v24 = vpop.f32.mrf.mxu1 }
  0xf6   : > { %v471_v28 = vadd.f32 %v470_v24, %v407_v23 }
  0xf7   : > { %v583_v25 = vmul.f32 %v1335_v17, %v563_v22 }
  0xf9   : > { %v603_v26 = vadd.f32 %v1340_v20, %v583_v25 }
  0xfa   : > { %v546_v31 = vpop.f32.mrf.mxu3 }
  0xfb   : > { %v619_v30 = vmax.f32 %v603_v26, 0.0  ;;  %v568_v33 = vadd.f32 %v546_v31, %v481_v29 }
  0xfc   : > { %v536_v32 = vpop.f32.mrf.mxu2  ;;  %v409_v35 = vpop.f32.mrf.mxu0 }
  0xfd   : > { %635 = vst [vmem:[%s1347_s30 + $0x38] sm:$0xff] %v619_v30  ;;  %v564_v34 = vadd.f32 %v536_v32, %v471_v28  ;;  %v588_v37 = vmul.f32 %v1335_v17, %v568_v33  ;;  %v472_v38 = vpop.f32.mrf.mxu1 }
  0xfe   : > { %v473_v44 = vadd.f32 %v472_v38, %v409_v35 }
  0xff   : > { %v584_v39 = vmul.f32 %v1335_v17, %v564_v34  ;;  %v608_v40 = vadd.f32 %v1340_v20, %v588_v37 }
 0x101   : > { %v604_v41 = vadd.f32 %v1340_v20, %v584_v39  ;;  %v624_v42 = vmax.f32 %v608_v40, 0.0 }
 0x102   : > { %v548_v46 = vpop.f32.mrf.mxu3 }
 0x103   : > { %v620_v43 = vmax.f32 %v604_v41, 0.0  ;;  %640 = vst [vmem:[%s1347_s30 + $0x60] sm:$0xff] %v624_v42  ;;  %v569_v48 = vadd.f32 %v548_v46, %v483_v16 }
 0x104   : > { %v538_v47 = vpop.f32.mrf.mxu2  ;;  %v412_v51 = vpop.f32.mrf.mxu0 }
 0x105   : > { %636 = vst [vmem:[%s1347_s30 + $0x40] sm:$0xff] %v620_v43  ;;  %v565_v49 = vadd.f32 %v538_v47, %v473_v44  ;;  %v589_v50 = vmul.f32 %v1335_v17, %v569_v48  ;;  %v475_v52 = vpop.f32.mrf.mxu1 }
 0x106   : > { %v476_v55 = vadd.f32 %v475_v52, %v412_v51 }
 0x107   : > { %v585_v53 = vmul.f32 %v1335_v17, %v565_v49  ;;  %v609_v27 = vadd.f32 %v1340_v20, %v589_v50 }
 0x109   : > { %v605_v54 = vadd.f32 %v1340_v20, %v585_v53  ;;  %v625_v57 = vmax.f32 %v609_v27, 0.0 }
 0x10a   : > { %v551_v59 = vpop.f32.mrf.mxu3 }
 0x10b   : > { %v621_v58 = vmax.f32 %v605_v54, 0.0  ;;  %641 = vst [vmem:[%s1347_s30 + $0x68] sm:$0xff] %v625_v57  ;;  %v570_v61 = vadd.f32 %v551_v59, %v486_v56 }
 0x10c   : > { %v541_v60 = vpop.f32.mrf.mxu2  ;;  %v414_v36 = vpop.f32.mrf.mxu0 }
 0x10d   : > { %637 = vst [vmem:[%s1347_s30 + $0x48] sm:$0xff] %v621_v58  ;;  %v566_v62 = vadd.f32 %v541_v60, %v476_v55  ;;  %v590_v63 = vmul.f32 %v1335_v17, %v570_v61  ;;  %v477_v2 = vpop.f32.mrf.mxu1 }
 0x10e   : > { %v478_v7 = vadd.f32 %v477_v2, %v414_v36 }
 0x10f   : > { %v586_v0 = vmul.f32 %v1335_v17, %v566_v62  ;;  %v610_v1 = vadd.f32 %v1340_v20, %v590_v63 }
 0x111   : > { %v606_v3 = vadd.f32 %v1340_v20, %v586_v0  ;;  %v626_v5 = vmax.f32 %v610_v1, 0.0 }
 0x112   : > { %v553_v8 = vpop.f32.mrf.mxu3 }
 0x113   : > { %v622_v6 = vmax.f32 %v606_v3, 0.0  ;;  %642 = vst [vmem:[%s1347_s30 + $0x70] sm:$0xff] %v626_v5  ;;  %v571_v10 = vadd.f32 %v553_v8, %v488_v4 }
 0x114   : > { %v543_v9 = vpop.f32.mrf.mxu2 }
 0x115   : > { %638 = vst [vmem:[%s1347_s30 + $0x50] sm:$0xff] %v622_v6  ;;  %v567_v11 = vadd.f32 %v543_v9, %v478_v7  ;;  %v591_v12 = vmul.f32 %v1335_v17, %v571_v10 }
 0x117   : > { %v587_v45 = vmul.f32 %v1335_v17, %v567_v11  ;;  %v611_v13 = vadd.f32 %v1340_v20, %v591_v12 }
 0x119   : > { %v607_v14 = vadd.f32 %v1340_v20, %v587_v45  ;;  %v627_v15 = vmax.f32 %v611_v13, 0.0 }
 0x11b   : > { %v623_v18 = vmax.f32 %v607_v14, 0.0  ;;  %643 = vst [vmem:[%s1347_s30 + $0x78] sm:$0xff] %v627_v15 }
 0x11d   : > { %639 = vst [vmem:[%s1347_s30 + $0x58] sm:$0xff] %v623_v18 }
 0x11e   : > { %1055 = shalt.err (!%p1052_p13)
}
 0x11f   : > { %s1135_s16 = smov 128   ;;  %s1136_s24 = smov 8  }
 0x120   : > { %879 = dma.vmem_to_hbm [thread:$0]  (%p1258_p3), %s660_s8, 2048, %s662_s10, %s645_s11, %s1135_s16, %s1135_s16, %s1136_s24  }
 0x121 PF: > { %s1483_s27 = sld [smem:[#allocation14_spill]] }
 0x122   : > { %s1484_s29 = sld [smem:[#allocation12_spill]] }
 0x127   : > { %p896_p0 = scmp.ge.s32.totalorder %s1483_s27, 2 }
 0x128   : > { %s676_s9 = sand.u32 1, %s1484_s29  }
 0x129   : > { %p890_p5 = pnand %p896_p0, %p1226_p6  ;;  %s677_s14 = scalar_lea.sflag [#allocation5], %s676_s9 }
 0x12b   : > { %p891_p7 = pneg %p890_p5 }
 0x12d   : > { %1097 = dma.done.wait (%p891_p7), %s677_s14, 2048  }
 0x12e   : > { %1099 = vsyncadd (%p891_p7), %s677_s14, 4294965248  ;;  %s23_s24 = sadd.s32 1, %s1483_s27   ;;  %s1486_s20 = sld [smem:[#allocation13_spill]] }
 0x12f   : > { %p20_p9 = scmp.ge.s32.totalorder %s23_s24, 6   ;;  %s1487_s22 = sld [smem:[#allocation16_spill]] }
 0x130   : > { %s1488_s15 = sld [smem:[#allocation18_spill]]  ;;  %s1489_s0 = smov %s1106_s18 }
 0x131   : > { %s1490_s18 = smov %s1110_s19  ;;  %s1491_s19 = smov %s1271_s12 }
 0x132   : > { %s1492_s21 = smov %s1126_s23  ;;  %22 = sbr.rel (!%p20_p9) target bundleno = 10 (0xa), region = 91 }
 0x136   : > { %s1493_s23 = smov %s1488_s15 }
 0x137   :  { %683 = vsyncpa [#allocation4], 1 }
 0x138   :  { %685 = vsyncpa [#allocation4 + $0x1], 1 }
 0x139   :  { %686 = vsyncpa [#allocation7], 1 }
 0x13a   :  { %687 = vsyncpa [#allocation5], 1 }
 0x13b   :  { %689 = vsyncpa [#allocation5 + $0x1], 1 }

</bundles_post_ra>
